<compile_context>
chip_gen: v7x
topology: tpu7x:2x2x1
jax: 0.10.0
libtpu: 0.0.40
codegen_flags: <defaults>
</compile_context>

<pallas_src>
import jax
import jax.numpy as jnp
from jax.experimental import pallas as pl
from jax.experimental.pallas import tpu as pltpu


def _affine_kernel(x_ref, logit_ref):
    # Pure streaming elementwise affine on a lane-dense (TB, A) tile.
    logit_ref[...] = 99.9 * (x_ref[...] - 1.0)


def _num_tensorcores_per_chip():
    # Best-effort detection: v7x has 2 TensorCores per chip, v5e/v6e have 1.
    try:
        kind = jax.devices()[0].device_kind.lower()
        if "v7" in kind or "7x" in kind:
            return 2
    except Exception:
        pass
    return 1


def _round_up(x, m):
    return ((x + m - 1) // m) * m


def _pick_block_rows(B, A, itemsize, num_tc):
    """Rows per block: big enough to amortize per-step overhead, small enough
    for v5e's 16 MiB default scoped-VMEM (in+out, double-buffered)."""
    # Sublane-packing-friendly row multiple (8 for 32-bit, 16 for 16-bit, ...).
    mult = 8 if itemsize >= 4 else (16 if itemsize == 2 else 32)
    budget_per_buffer = 2 * 1024 * 1024  # ~2 MiB -> ~8 MiB total buffered
    cap = (budget_per_buffer // max(1, A * itemsize)) // mult * mult
    cap = max(mult, min(2048, cap))
    if B <= cap:
        # Megacore: on multi-TC chips, ensure >= 2 grid steps for moderate B
        # so both TensorCores stream.  Whole-batch block otherwise.
        if num_tc > 1 and B >= 2 * mult:
            return min(B, _round_up(pl.cdiv(B, 2), mult))
        return B
    return cap


def core_model_trivial_forward(point_encoded, dir_encoded, board_size, *,
                               force_pallas=False,
                               propagate_value_nans=False):
    """Pallas implementation of CoreModelTrivial.forward.

    point_encoded: [B, C, board_size, board_size]
    dir_encoded:   [B, D1, D2, board_size, board_size]
    Returns (logit, value) with logit: [B, board_size**2], value: [B].
    """
    B, C = point_encoded.shape[0], point_encoded.shape[1]
    A = board_size * board_size
    itemsize = jnp.dtype(point_encoded.dtype).itemsize

    # value = sum(dir_encoded) * 0.0 == 0 for finite inputs.  By default it is
    # produced as a constant so dir_encoded is never read from HBM.
    if propagate_value_nans:
        # Exact PyTorch semantics (NaN/Inf propagate); plain-JAX reduction.
        value = jnp.sum(dir_encoded, axis=(1, 2, 3, 4)) * 0.0
    else:
        # TODO(synk): accepted simplification — NaN/Inf in dir_encoded do not
        # propagate to value unless propagate_value_nans=True.
        value = jnp.zeros((B,), dtype=dir_encoded.dtype)

    # Small-batch fast path: the pallas_call fixed cost dominates below ~1 MiB
    # of logit data; let XLA emit one fused elementwise op instead.
    if not force_pallas and B * A * itemsize < (1 << 20):
        logit = 99.9 * (point_encoded[:, 0, :, :].reshape(B, A) - 1.0)
        return logit, value

    # Free view (contiguous dim-merge, no copy).  The BlockSpec below selects
    # channel 0 directly in the input DMA: block (TB, A) at block index (i, 0)
    # covers columns [0, A) == channel 0 of every batch row.
    x = point_encoded.reshape(B, C * A)

    TB = _pick_block_rows(B, A, itemsize, _num_tensorcores_per_chip())
    grid = (pl.cdiv(B, TB),)

    logit = pl.pallas_call(
        _affine_kernel,
        out_shape=jax.ShapeDtypeStruct((B, A), point_encoded.dtype),
        grid=grid,
        in_specs=[pl.BlockSpec((TB, A), lambda i: (i, 0))],
        out_specs=pl.BlockSpec((TB, A), lambda i: (i, 0)),
        compiler_params=pltpu.CompilerParams(
            dimension_semantics=("parallel",)),
    )(x)

    return logit, value


if __name__ == "__main__":
    key = jax.random.PRNGKey(0)
    k1, k2 = jax.random.split(key)

    B = 2
    C = 4
    board_size = 16          # action_size = 256
    D1, D2 = 4, 2

    point_encoded = jax.random.normal(
        k1, (B, C, board_size, board_size), dtype=jnp.float32)
    dir_encoded = jax.random.normal(
        k2, (B, D1, D2, board_size, board_size), dtype=jnp.float32)

    # Reference (plain-JAX semantics of the PyTorch forward).
    ref_logit = 99.9 * (point_encoded[:, 0, :, :]
                        .reshape(B, board_size * board_size) - 1.0)
    ref_value = jnp.sum(dir_encoded, axis=(1, 2, 3, 4)) * 0.0

    # 1) Force the Pallas path (even though B=2 is below the fast-path cutoff)
    #    so the kernel itself is exercised and validated.
    logit, value = core_model_trivial_forward(
        point_encoded, dir_encoded, board_size, force_pallas=True)
    logit, value = jax.block_until_ready((logit, value))

    assert logit.shape == (B, board_size * board_size)
    assert value.shape == (B,)
    assert logit.dtype == point_encoded.dtype
    assert value.dtype == dir_encoded.dtype
    assert jnp.allclose(logit, ref_logit, atol=1e-5, rtol=1e-5)
    assert jnp.allclose(value, ref_value, atol=1e-6)

    # 2) Default dispatch (small-batch fast path) must agree as well.
    logit_fp, value_fp = jax.block_until_ready(
        core_model_trivial_forward(point_encoded, dir_encoded, board_size))
    assert jnp.allclose(logit_fp, ref_logit, atol=1e-5, rtol=1e-5)
    assert jnp.allclose(value_fp, ref_value, atol=1e-6)

    print("KERNEL_OK")
</pallas_src>

<mosaic_0001>
module attributes {stable_mosaic.version = 11 : i64} {
  func.func @_affine_kernel(%arg0: i32, %arg1: memref<2x256xf32, #tpu.memory_space<vmem>>, %arg2: memref<2x256xf32, #tpu.memory_space<vmem>>) attributes {dimension_semantics = [#tpu.dimension_semantics<parallel>], iteration_bounds = array<i64: 1>, scalar_prefetch = 0 : i64, scratch_operands = 0 : i64, tpu.core_type = #tpu.core_type<tc>, window_params = [{transform_indices = @transform_0, window_bounds = array<i64: 2, 256>}, {transform_indices = @transform_1, window_bounds = array<i64: 2, 256>}]} {
    %c0 = arith.constant 0 : index
    %c0_0 = arith.constant 0 : index
    %0 = vector.load %arg1[%c0, %c0_0] : memref<2x256xf32, #tpu.memory_space<vmem>>, vector<2x256xf32>
    %cst = arith.constant 1.000000e+00 : f32
    %1 = vector.broadcast %cst : f32 to vector<2x256xf32>
    %2 = arith.subf %0, %1 : vector<2x256xf32>
    %cst_1 = arith.constant 9.990000e+01 : f32
    %3 = vector.broadcast %cst_1 : f32 to vector<2x256xf32>
    %4 = arith.mulf %3, %2 : vector<2x256xf32>
    %c0_2 = arith.constant 0 : index
    %c0_3 = arith.constant 0 : index
    %5 = vector.load %arg2[%c0_2, %c0_3] : memref<2x256xf32, #tpu.memory_space<vmem>>, vector<2x256xf32>
    tpu.vector_store %arg2[%c0_2, %c0_3], %4 {strides = array<i32>} : memref<2x256xf32, #tpu.memory_space<vmem>>, vector<2x256xf32>,
    return
  }
  func.func @transform_0(%arg0: i32) -> (i32, i32) {
    %c0_i32 = arith.constant 0 : i32
    %c0_i32_0 = arith.constant 0 : i32
    return %arg0, %c0_i32 : i32, i32
  }
  func.func @transform_1(%arg0: i32) -> (i32, i32) {
    %c0_i32 = arith.constant 0 : i32
    %c0_i32_0 = arith.constant 0 : i32
    return %arg0, %c0_i32 : i32, i32
  }
}

</mosaic_0001>

<bundles_post_ra>
// kernel: tpu_custom_call.1
= control target key start
LH: loop header
LB: loop body
LE: loop exit
PB: predicated region body
PF: predicated region fallthrough
CT: control target
= control target key end

     0   :  { %6 = vsyncpa [#allocation3], 0  ;;  %s130_s0 = inlined_call_operand.hbm [shape: f32[2,1024], index: 0, kind: input, shape index: {}]   ;;  %s131_s1 = inlined_call_operand.hbm [shape: f32[2,256], index: 1, kind: output, shape index: {}]  }
   0x1   :  { %7 = vsyncpa [#allocation4], 0  ;;  %s91_s6 = smov [#allocation2]   ;;  %s43_s10 = scalar_lea.hbm %s130_s0, 64 }
   0x2   :  { %s14_s7 = sshll.u32 %s91_s6, 4  ;;  %p44_p0 = scmp.ne.s32.totalorder %s130_s0, %s43_s10  ;;  %s15_s7 = int_to_ptr.vmem [resolvable:$true] %s14_s7 }
   0x3   :  { %s45_s15 = scalar_lea.hbm %s130_s0, 256  ;;  %p47_p2 = scmp.lt.u32.totalorder %s43_s10, %s130_s0 }
   0x4   :  { %p46_p1 = scmp.lt.u32.totalorder %s45_s15, %s43_s10 }
   0x6   :  { %p48_p3 = por %p47_p2, %p46_p1 }
   0x8   :  { %p49_p4 = pnand %p48_p3, %p44_p0 }
   0xa   :  { %52 = shalt.err (!%p49_p4)
}
   0xb   :  { %s53_s18 = scalar_lea.vmem %s15_s7, 64  ;;  %p58_p6 = scmp.lt.s32.totalorder %s15_s7, %s15_s7 }
   0xc   :  { %p54_p5 = scmp.ne.s32.totalorder %s15_s7, %s53_s18  ;;  %p59_p7 = scmp.lt.s32.totalorder %s53_s18, %s53_s18 }
   0xe   :  { %p60_p8 = por %p59_p7, %p58_p6 }
  0x10   :  { %p61_p9 = pnand %p60_p8, %p54_p5 }
  0x12   :  { %64 = shalt.err (!%p61_p9)
}
  0x13   :  { %17 = dma.hbm_to_vmem [thread:$0]  %s130_s0, 64, %s15_s7, [#allocation3]  }
  0x14   :  { %87 = dma.done.wait [#allocation3], 64  }
  0x15   :  { %88 = vsyncadd [#allocation3], 4294967232  ;;  %v21_v0 = vld [vmem:[#allocation2] sm:$0xf]  ;;  %s92_s21 = smov [#allocation5]  }
  0x16   :  { %s31_s22 = sshll.u32 %s92_s21, 4  ;;  %v40_v1 = vadd.f32 -1.0, %v21_v0  ;;  %s32_s22 = int_to_ptr.vmem [resolvable:$true] %s31_s22 }
  0x17   :  { %s65_s23 = scalar_lea.vmem %s32_s22, 64  ;;  %p70_p11 = scmp.lt.s32.totalorder %s32_s22, %s32_s22 }
  0x18   :  { %v23_v2 = vmul.f32 99.9, %v40_v1  ;;  %p66_p10 = scmp.ne.s32.totalorder %s32_s22, %s65_s23  ;;  %p71_p12 = scmp.lt.s32.totalorder %s65_s23, %s65_s23 }
  0x1a   :  { %24 = vst [vmem:[#allocation5] sm:$0xf] %v23_v2  ;;  %p72_p13 = por %p71_p12, %p70_p11 }
  0x1c   :  { %p73_p0 = pnand %p72_p13, %p66_p10 }
  0x1e   :  { %76 = shalt.err (!%p73_p0)
}
  0x1f   :  { %s77_s0 = scalar_lea.hbm %s131_s1, 64 }
  0x20   :  { %p78_p1 = scmp.ne.s32.totalorder %s131_s1, %s77_s0  ;;  %p81_p2 = scmp.lt.u32.totalorder %s77_s0, %s131_s1 }
  0x22   :  { %p83_p3 = pnand %p81_p2, %p78_p1 }
  0x24   :  { %86 = shalt.err (!%p83_p3)
}
  0x25   :  { %34 = dma.vmem_to_hbm [thread:$0]  %s32_s22, 64, %s131_s1, [#allocation4]  }
  0x26   :  { %89 = dma.done.wait [#allocation4], 64  }
  0x27   :  { %90 = vsyncadd [#allocation4], 4294967232 }
  0x28   :  { %38 = vsyncpa [#allocation3], 1 }
  0x29   :  { %39 = vsyncpa [#allocation4], 1 }

</bundles_post_ra>
